<compile_context>
chip_gen: v7x
topology: tpu7x:2x2x1
jax: 0.10.0
libtpu: 0.0.40
codegen_flags: <defaults>
</compile_context>

<pallas_src>
import functools

import numpy as np
import jax
import jax.numpy as jnp
from jax.experimental import pallas as pl
from jax.experimental.pallas import tpu as pltpu


def _round_up(x, m):
    return ((x + m - 1) // m) * m


def _cdiv(a, b):
    return (a + b - 1) // b


@functools.lru_cache(maxsize=None)
def _vmem_budget_bytes():
    """Per-core VMEM budget derived from the chip (falls back to the most
    conservative value, v7x's 64 MiB)."""
    cap = 64 << 20
    try:
        cap = int(pltpu.get_tpu_info().vmem_capacity_bytes)
    except Exception:
        pass
    return max(24 << 20, (cap * 3) // 4)


# ----------------------------------------------------------------------------
# Pallas kernel: one SSSLoss scale, one (batch, chunk, freq-tile, frame-tile).
# ----------------------------------------------------------------------------
def _sss_kernel(xt_ref, xp_ref, w_ref, dsq_ref, ssq_ref, l1_ref, *,
                f_tile, nf_tile, eps):
    rj = pl.program_id(2)          # reduction axis
    rf = pl.program_id(3)          # reduction axis

    @pl.when((rj == 0) & (rf == 0))
    def _():
        dsq_ref[...] = jnp.zeros_like(dsq_ref)
        ssq_ref[...] = jnp.zeros_like(ssq_ref)
        l1_ref[...] = jnp.zeros_like(l1_ref)

    # Two MXU matmuls against the same fused [real | imag] DFT basis
    # (bf16 operands, f32 accumulation).  No wrapper-side concat needed.
    w = w_ref[0]                                     # (k_pad, 2*nf_tile)
    yt = jnp.dot(xt_ref[0], w, preferred_element_type=jnp.float32)
    yp = jnp.dot(xp_ref[0], w, preferred_element_type=jnp.float32)

    tr, ti = yt[:, :nf_tile], yt[:, nf_tile:]
    pr, pi = yp[:, :nf_tile], yp[:, nf_tile:]
    s_true = jnp.sqrt(tr * tr + ti * ti) + eps
    s_pred = jnp.sqrt(pr * pr + pi * pi) + eps

    d = s_true - s_pred
    s = s_true + s_pred
    # |log(S_true/S_pred)| with one EUP log + one approx reciprocal.  Written
    # as log(1 + d / S_pred) so padded cells (d == 0 exactly) contribute an
    # exact 0 despite the approximate reciprocal -> no mask needed.
    la = jnp.abs(jnp.log(1.0 + d * pl.reciprocal(s_pred, approx=True)))

    # Accumulate into 8-sublane partials: full-vreg VPU adds, no XLU sublane
    # reduce per step.  The final 8->1 and cross-lane reduces happen in JAX.
    r = f_tile // 8
    dsq_ref[...] += jnp.sum((d * d).reshape(r, 8, nf_tile), axis=0)[None]
    ssq_ref[...] += jnp.sum((s * s).reshape(r, 8, nf_tile), axis=0)[None]
    l1_ref[...] += jnp.sum(la.reshape(r, 8, nf_tile), axis=0)[None]


# ----------------------------------------------------------------------------
# Host-side DFT basis (torchaudio Spectrogram: periodic hann, power=1,
# normalized=True ("window" norm), center=False).
# ----------------------------------------------------------------------------
def _dft_basis(n_fft):
    n = np.arange(n_fft, dtype=np.float64)
    k = np.arange(n_fft // 2 + 1, dtype=np.float64)
    win = 0.5 * (1.0 - np.cos(2.0 * np.pi * n / n_fft))      # periodic hann
    norm = np.sqrt(np.sum(win ** 2))
    ang = 2.0 * np.pi * np.outer(n, k) / n_fft
    wr = (win[:, None] * np.cos(ang)) / norm
    wi = (-win[:, None] * np.sin(ang)) / norm
    return wr.astype(np.float32), wi.astype(np.float32)


@functools.lru_cache(maxsize=None)
def _fused_basis(n_fft, k_pad, nf_tile, n_jt, n_freq_kernel, tail,
                 matmul_dtype):
    """Kernel basis (n_jt, k_pad, 2*nf_tile): per-freq-tile [real | imag],
    zero padded; plus the wrapper tail basis (n_fft, 2*tail)."""
    wr, wi = _dft_basis(n_fft)                       # (n_fft, n_freq)
    nf_tot = nf_tile * n_jt
    wr_k = np.zeros((k_pad, nf_tot), np.float32)
    wi_k = np.zeros((k_pad, nf_tot), np.float32)
    wr_k[:n_fft, :n_freq_kernel] = wr[:, :n_freq_kernel]
    wi_k[:n_fft, :n_freq_kernel] = wi[:, :n_freq_kernel]
    # The wrapper's eps-padding correction relies on the padding being zero.
    assert not wr_k[n_fft:, :].any() and not wr_k[:, n_freq_kernel:].any()
    assert not wi_k[n_fft:, :].any() and not wi_k[:, n_freq_kernel:].any()
    wr_k = wr_k.reshape(k_pad, n_jt, nf_tile).transpose(1, 0, 2)
    wi_k = wi_k.reshape(k_pad, n_jt, nf_tile).transpose(1, 0, 2)
    w = jnp.asarray(np.concatenate([wr_k, wi_k], axis=2), dtype=matmul_dtype)
    if tail > 0:
        wt = np.concatenate([wr[:, n_freq_kernel:], wi[:, n_freq_kernel:]],
                            axis=1)
        w_tail = jnp.asarray(wt, dtype=matmul_dtype)
    else:
        w_tail = None
    return w, w_tail


# ----------------------------------------------------------------------------
# Tile / budget selection.
# ----------------------------------------------------------------------------
def _choose_tiles(n_frames, n_freq_kernel, n_fft, budget, esz):
    k_pad = _round_up(n_fft, 128)
    nf_pad = _round_up(max(n_freq_kernel, 1), 128)
    f_pad0 = _round_up(n_frames, 8)

    def footprint(ft, nt):
        return (2 * 2 * ft * k_pad * esz          # two frame inputs, 2 bufs
                + 2 * k_pad * 2 * nt * esz        # fused basis, 2 bufs
                + 12 * ft * nt * 4                # matmul results + temps
                + 3 * 2 * 8 * nt * 4              # accumulator outputs
                + (2 << 20))                      # compiler scratch slack

    # Frame tile: ~256 rows (amortizes the MXU RHS push) while minimizing
    # zero-padded frame rows.
    f_tile = _round_up(_cdiv(f_pad0, _cdiv(f_pad0, 256)), 8)
    # Frequency tile: whole 128-aligned band if it fits (n_jt == 1 avoids
    # re-streaming the frames); otherwise split as evenly as possible.
    nf_tile, n_jt = nf_pad, 1
    while footprint(f_tile, nf_tile) > budget and nf_tile > 128:
        n_jt += 1
        nf_tile = _round_up(_cdiv(nf_pad, n_jt), 128)
    while footprint(f_tile, nf_tile) > budget and f_tile > 64:
        f_tile = _round_up(f_tile // 2, 8)
    return k_pad, nf_pad, f_pad0, f_tile, nf_tile


# ----------------------------------------------------------------------------
# pallas_call wrapper (jitted per static configuration).
# ----------------------------------------------------------------------------
@functools.partial(
    jax.jit,
    static_argnames=("n_fft", "n_frames", "n_freq", "n_freq_kernel", "tail",
                     "k_pad", "f_tile", "n_ft_per_chunk", "n_chunks",
                     "nf_tile", "n_jt", "freq_outer", "alpha", "eps",
                     "matmul_dtype", "vmem_limit"))
def _sss_call(x_true, x_pred, w, w_tail, *, n_fft, n_frames, n_freq,
              n_freq_kernel, tail, k_pad, f_tile, n_ft_per_chunk, n_chunks,
              nf_tile, n_jt, freq_outer, alpha, eps, matmul_dtype, vmem_limit):
    B = x_true.shape[0]
    f_pad = f_tile * n_ft_per_chunk * n_chunks
    nf_tot = nf_tile * n_jt

    def frame(x):
        fr = x[:, : n_frames * n_fft].reshape(B, n_frames, n_fft)
        fr = fr.astype(matmul_dtype)          # no-op when cast was hoisted
        padded = jnp.pad(fr, ((0, 0), (0, f_pad - n_frames),
                              (0, k_pad - n_fft)))
        return fr, padded

    fr_t, xt = frame(x_true)
    fr_p, xp = frame(x_pred)

    kernel = functools.partial(_sss_kernel, f_tile=f_tile, nf_tile=nf_tile,
                               eps=float(eps))

    if freq_outer:   # j outer / f inner: basis block resident, frames stream.
        grid = (B, n_chunks, n_jt, n_ft_per_chunk)
        frames_map = lambda b, c, j, f: (b, c * n_ft_per_chunk + f, 0)
        basis_map = lambda b, c, j, f: (j, 0, 0)
        out_map = lambda b, c, j, f: (b, c, 0)
    else:            # f outer / j inner: frames read once, basis re-streamed.
        grid = (B, n_chunks, n_ft_per_chunk, n_jt)
        frames_map = lambda b, c, f, j: (b, c * n_ft_per_chunk + f, 0)
        basis_map = lambda b, c, f, j: (j, 0, 0)
        out_map = lambda b, c, f, j: (b, c, 0)

    dsq, ssq, l1 = pl.pallas_call(
        kernel,
        out_shape=(jax.ShapeDtypeStruct((B, n_chunks * 8, nf_tile),
                                        jnp.float32),) * 3,
        grid_spec=pltpu.PrefetchScalarGridSpec(
            num_scalar_prefetch=0,
            grid=grid,
            in_specs=[
                pl.BlockSpec((1, f_tile, k_pad), frames_map),
                pl.BlockSpec((1, f_tile, k_pad), frames_map),
                pl.BlockSpec((1, k_pad, 2 * nf_tile), basis_map),
            ],
            out_specs=[pl.BlockSpec((1, 8, nf_tile), out_map)] * 3,
        ),
        compiler_params=pltpu.CompilerParams(
            dimension_semantics=("parallel", "parallel", "arbitrary",
                                 "arbitrary"),
            vmem_limit_bytes=int(vmem_limit)),
    )(xt, xp, w)

    # Finalize in JAX (the sqrt ratio / means are not additive across tiles).
    dsq_b = jnp.sum(dsq, axis=(1, 2))
    n_pad_cells = f_pad * nf_tot - n_frames * n_freq_kernel
    ssq_b = jnp.sum(ssq, axis=(1, 2)) - n_pad_cells * (2.0 * eps) ** 2
    l1_sum = jnp.sum(l1)

    if tail > 0:
        # Small remainder bins (e.g. the Nyquist bin for power-of-two n_fft)
        # computed with a tiny einsum so the kernel's lane extent stays
        # padding-free.
        def tail_mag(fr):
            y = jnp.einsum("bfn,nk->bfk", fr, w_tail,
                           preferred_element_type=jnp.float32)
            re, im = y[..., :tail], y[..., tail:]
            return jnp.sqrt(re * re + im * im) + eps
        st, sp = tail_mag(fr_t), tail_mag(fr_p)
        dsq_b = dsq_b + jnp.sum((st - sp) ** 2, axis=(1, 2))
        ssq_b = ssq_b + jnp.sum((st + sp) ** 2, axis=(1, 2))
        l1_sum = l1_sum + jnp.sum(jnp.abs(jnp.log(st) - jnp.log(sp)))

    converge = jnp.mean(jnp.sqrt(dsq_b) / jnp.sqrt(ssq_b))
    log_term = l1_sum / float(B * n_frames * n_freq)
    return converge + alpha * log_term


def sss_loss_pallas(x_true, x_pred, n_fft, alpha=1.0, eps=1e-7,
                    matmul_dtype=jnp.bfloat16):
    """Single-scale spectral loss (SSSLoss.forward) for one static n_fft."""
    B, T = x_true.shape
    if T < n_fft:
        raise ValueError("signal shorter than n_fft")
    n_frames = 1 + (T - n_fft) // n_fft          # hop == n_fft (overlap = 0)
    n_freq = n_fft // 2 + 1

    # Kernel covers a 128-aligned main frequency band; a small remainder is
    # folded in by the wrapper (avoids up to ~2x dead MXU/EUP lane work).
    rem = n_freq % 128
    tail = rem if (n_freq > 128 and 0 < rem <= 32) else 0
    n_freq_kernel = n_freq - tail

    esz = np.dtype(matmul_dtype).itemsize
    budget = _vmem_budget_bytes()
    k_pad, nf_pad, f_pad0, f_tile, nf_tile = _choose_tiles(
        n_frames, n_freq_kernel, n_fft, budget, esz)
    n_jt = _cdiv(nf_pad, nf_tile)

    n_ft_raw = _cdiv(f_pad0, f_tile)
    # Extra "parallel" chunk axis so dual-TensorCore chips stay busy when B is
    # 1 or odd.
    n_chunks = 2 if (B % 2 == 1 and n_ft_raw >= 2) else 1
    n_ft_per_chunk = _cdiv(n_ft_raw, n_chunks)
    f_pad = f_tile * n_ft_per_chunk * n_chunks

    # Reduction-axis order: re-stream whichever operand is cheaper when the
    # frequency axis must be split (n_jt > 1).  n_jt == 1 -> freq_outer.
    frames_bytes = 2 * B * f_pad * k_pad * esz
    basis_bytes = n_jt * k_pad * 2 * nf_tile * esz
    freq_outer = bool((n_jt - 1) * frames_bytes
                      <= B * n_chunks * (n_ft_per_chunk - 1) * basis_bytes)

    vmem_est = (2 * 2 * f_tile * k_pad * esz
                + 2 * k_pad * 2 * nf_tile * esz
                + 12 * f_tile * nf_tile * 4
                + 3 * 2 * 8 * nf_tile * 4
                + (2 << 20))
    vmem_limit = int(min(budget, max(vmem_est, 16 << 20)))

    w, w_tail = _fused_basis(n_fft, k_pad, nf_tile, n_jt, n_freq_kernel, tail,
                             matmul_dtype)
    return _sss_call(x_true, x_pred, w, w_tail, n_fft=n_fft,
                     n_frames=n_frames, n_freq=n_freq,
                     n_freq_kernel=n_freq_kernel, tail=tail, k_pad=k_pad,
                     f_tile=f_tile, n_ft_per_chunk=n_ft_per_chunk,
                     n_chunks=n_chunks, nf_tile=nf_tile, n_jt=n_jt,
                     freq_outer=freq_outer, alpha=float(alpha),
                     eps=float(eps), matmul_dtype=matmul_dtype,
                     vmem_limit=vmem_limit)


def rss_loss_pallas(x_pred, x_true, *, fft_min, fft_max, n_scale,
                    alpha=1.0, eps=1e-7, seed=0, matmul_dtype=jnp.bfloat16):
    """Random-scale spectral loss (RSSLoss.forward)."""
    # torch.randint equivalent; every scale needs a static shape, so the draw
    # uses a host numpy RNG (no device round-trip).  NOTE: a fixed seed
    # reproduces the same n_ffts each call (PyTorch draws fresh per forward).
    rng = np.random.default_rng(seed)
    n_ffts = [int(v) for v in rng.integers(fft_min, fft_max, size=n_scale)]
    # Hoist the matmul-dtype cast out of the per-scale loop (one HBM pass).
    xt = x_true.astype(matmul_dtype)
    xp = x_pred.astype(matmul_dtype)
    # TODO(synk): fuse all scales into one pallas_call (pad to max n_fft).
    value = jnp.float32(0.0)
    for n_fft in n_ffts:
        # RSSLoss.forward calls loss_func(x_true, x_pred): keep that order.
        value = value + sss_loss_pallas(xt, xp, n_fft, alpha, eps,
                                        matmul_dtype)
    return value / n_scale, n_ffts


# ----------------------------------------------------------------------------
# Pure-JAX reference (no padding / tiling) for sanity checks.
# ----------------------------------------------------------------------------
def _sss_ref(x_true, x_pred, n_fft, alpha=1.0, eps=1e-7,
             matmul_dtype=jnp.float32):
    B, T = x_true.shape
    n_frames = 1 + (T - n_fft) // n_fft
    wr, wi = _dft_basis(n_fft)
    wr = jnp.asarray(wr).astype(matmul_dtype)
    wi = jnp.asarray(wi).astype(matmul_dtype)
    ft = x_true[:, : n_frames * n_fft].reshape(B, n_frames, n_fft).astype(matmul_dtype)
    fp = x_pred[:, : n_frames * n_fft].reshape(B, n_frames, n_fft).astype(matmul_dtype)

    def mag(fr):
        re = jnp.einsum("bfn,nk->bfk", fr, wr,
                        preferred_element_type=jnp.float32)
        im = jnp.einsum("bfn,nk->bfk", fr, wi,
                        preferred_element_type=jnp.float32)
        return jnp.sqrt(re * re + im * im) + eps

    st, sp = mag(ft), mag(fp)
    conv = jnp.mean(jnp.sqrt(jnp.sum((st - sp) ** 2, axis=(1, 2))) /
                    jnp.sqrt(jnp.sum((st + sp) ** 2, axis=(1, 2))))
    log_term = jnp.mean(jnp.abs(jnp.log(st) - jnp.log(sp)))
    return conv + alpha * log_term


if __name__ == "__main__":
    key = jax.random.PRNGKey(0)
    k_pred, k_true = jax.random.split(key)

    B, T = 2, 256
    fft_min, fft_max, n_scale = 16, 32, 3
    alpha, eps = 1.0, 1e-7

    x_pred = jax.random.normal(k_pred, (B, T), dtype=jnp.float32)
    x_true = jax.random.normal(k_true, (B, T), dtype=jnp.float32)

    loss, n_ffts = rss_loss_pallas(x_pred, x_true, fft_min=fft_min,
                                   fft_max=fft_max, n_scale=n_scale,
                                   alpha=alpha, eps=eps, seed=0)
    loss = np.asarray(jax.block_until_ready(loss))

    # (1) Check vs a pure-JAX reference at matched (bf16) matmul precision:
    #     validates framing, padding, fused basis and tiling.  Tolerance
    #     covers the approximate reciprocal used in the log term.
    ref_bf16 = sum(_sss_ref(x_true, x_pred, n, alpha, eps, jnp.bfloat16)
                   for n in n_ffts) / n_scale
    np.testing.assert_allclose(loss,
                               np.asarray(jax.block_until_ready(ref_bf16)),
                               rtol=2e-2, atol=5e-3)

    # (2) Loose check vs the full-f32 reference (bf16 matmul precision budget).
    ref_f32 = sum(_sss_ref(x_true, x_pred, n, alpha, eps, jnp.float32)
                  for n in n_ffts) / n_scale
    np.testing.assert_allclose(loss,
                               np.asarray(jax.block_until_ready(ref_f32)),
                               rtol=5e-2, atol=1e-2)

    # (3) Exercise the wrapper tail path: n_fft=256 -> n_freq=129 -> 128 lanes
    #     in the kernel + the Nyquist bin folded in by the wrapper.
    x_pred2 = jax.random.normal(k_pred, (2, 1024), dtype=jnp.float32)
    x_true2 = jax.random.normal(k_true, (2, 1024), dtype=jnp.float32)
    out2 = sss_loss_pallas(x_true2.astype(jnp.bfloat16),
                           x_pred2.astype(jnp.bfloat16), 256, alpha, eps)
    ref2 = _sss_ref(x_true2, x_pred2, 256, alpha, eps, jnp.bfloat16)
    np.testing.assert_allclose(np.asarray(jax.block_until_ready(out2)),
                               np.asarray(jax.block_until_ready(ref2)),
                               rtol=2e-2, atol=5e-3)

    print("KERNEL_OK")
</pallas_src>

<mosaic_0001>
module attributes {stable_mosaic.version = 11 : i64} {
  func.func @_sss_kernel(%arg0: i32, %arg1: i32, %arg2: i32, %arg3: i32, %arg4: memref<1x8x128xbf16, #tpu.memory_space<vmem>>, %arg5: memref<1x8x128xbf16, #tpu.memory_space<vmem>>, %arg6: memref<1x128x256xbf16, #tpu.memory_space<vmem>>, %arg7: memref<1x8x128xf32, #tpu.memory_space<vmem>>, %arg8: memref<1x8x128xf32, #tpu.memory_space<vmem>>, %arg9: memref<1x8x128xf32, #tpu.memory_space<vmem>>) attributes {dimension_semantics = [#tpu.dimension_semantics<parallel>, #tpu.dimension_semantics<parallel>, #tpu.dimension_semantics<arbitrary>, #tpu.dimension_semantics<arbitrary>], iteration_bounds = array<i64: 2, 1, 1, 1>, scalar_prefetch = 0 : i64, scratch_operands = 0 : i64, tpu.core_type = #tpu.core_type<tc>, window_params = [{transform_indices = @transform_0, window_bounds = array<i64: 1, 8, 128>}, {transform_indices = @transform_1, window_bounds = array<i64: 1, 8, 128>}, {transform_indices = @transform_2, window_bounds = array<i64: 1, 128, 256>}, {transform_indices = @transform_3, window_bounds = array<i64: 1, 8, 128>}, {transform_indices = @transform_4, window_bounds = array<i64: 1, 8, 128>}, {transform_indices = @transform_5, window_bounds = array<i64: 1, 8, 128>}]} {
    %c0_i32 = arith.constant 0 : i32
    %0 = arith.cmpi eq, %arg2, %c0_i32 : i32
    %c0_i32_0 = arith.constant 0 : i32
    %1 = arith.cmpi eq, %arg3, %c0_i32_0 : i32
    %2 = arith.andi %0, %1 : i1
    %3 = arith.extui %2 : i1 to i32
    %c0_i32_1 = arith.constant 0 : i32
    %4 = arith.cmpi ne, %3, %c0_i32_1 : i32
    scf.if %4 {
      %cst_35 = arith.constant 0.000000e+00 : f32
      %57 = vector.broadcast %cst_35 : f32 to vector<1x8x128xf32>
      %c0_36 = arith.constant 0 : index
      %c0_37 = arith.constant 0 : index
      %c0_38 = arith.constant 0 : index
      %58 = vector.load %arg7[%c0_36, %c0_37, %c0_38] : memref<1x8x128xf32, #tpu.memory_space<vmem>>, vector<1x8x128xf32>
      tpu.vector_store %arg7[%c0_36, %c0_37, %c0_38], %57 {strides = array<i32>} : memref<1x8x128xf32, #tpu.memory_space<vmem>>, vector<1x8x128xf32>,
      %cst_39 = arith.constant 0.000000e+00 : f32
      %59 = vector.broadcast %cst_39 : f32 to vector<1x8x128xf32>
      %c0_40 = arith.constant 0 : index
      %c0_41 = arith.constant 0 : index
      %c0_42 = arith.constant 0 : index
      %60 = vector.load %arg8[%c0_40, %c0_41, %c0_42] : memref<1x8x128xf32, #tpu.memory_space<vmem>>, vector<1x8x128xf32>
      tpu.vector_store %arg8[%c0_40, %c0_41, %c0_42], %59 {strides = array<i32>} : memref<1x8x128xf32, #tpu.memory_space<vmem>>, vector<1x8x128xf32>,
      %cst_43 = arith.constant 0.000000e+00 : f32
      %61 = vector.broadcast %cst_43 : f32 to vector<1x8x128xf32>
      %c0_44 = arith.constant 0 : index
      %c0_45 = arith.constant 0 : index
      %c0_46 = arith.constant 0 : index
      %62 = vector.load %arg9[%c0_44, %c0_45, %c0_46] : memref<1x8x128xf32, #tpu.memory_space<vmem>>, vector<1x8x128xf32>
      tpu.vector_store %arg9[%c0_44, %c0_45, %c0_46], %61 {strides = array<i32>} : memref<1x8x128xf32, #tpu.memory_space<vmem>>, vector<1x8x128xf32>,
    } else {
    }
    %c0 = arith.constant 0 : index
    %c0_2 = arith.constant 0 : index
    %c0_3 = arith.constant 0 : index
    %5 = vector.load %arg6[%c0, %c0_2, %c0_3] : memref<1x128x256xbf16, #tpu.memory_space<vmem>>, vector<1x128x256xbf16>
    %6 = vector.shape_cast %5 : vector<1x128x256xbf16> to vector<128x256xbf16>
    %c0_4 = arith.constant 0 : index
    %c0_5 = arith.constant 0 : index
    %c0_6 = arith.constant 0 : index
    %7 = vector.load %arg4[%c0_4, %c0_5, %c0_6] : memref<1x8x128xbf16, #tpu.memory_space<vmem>>, vector<1x8x128xbf16>
    %8 = vector.shape_cast %7 : vector<1x8x128xbf16> to vector<8x128xbf16>
    %cst = arith.constant dense<0.000000e+00> : vector<8x256xf32>
    %9 = tpu.matmul %8, %6, %cst {dimension_numbers = #tpu.dot_dimension_numbers<[1], [0], [0], [1], [0, 0, 1, 1], [], []>} : vector<8x128xbf16>, vector<128x256xbf16>, vector<8x256xf32> -> vector<8x256xf32>
    %c0_7 = arith.constant 0 : index
    %c0_8 = arith.constant 0 : index
    %c0_9 = arith.constant 0 : index
    %10 = vector.load %arg5[%c0_7, %c0_8, %c0_9] : memref<1x8x128xbf16, #tpu.memory_space<vmem>>, vector<1x8x128xbf16>
    %11 = vector.shape_cast %10 : vector<1x8x128xbf16> to vector<8x128xbf16>
    %cst_10 = arith.constant dense<0.000000e+00> : vector<8x256xf32>
    %12 = tpu.matmul %11, %6, %cst_10 {dimension_numbers = #tpu.dot_dimension_numbers<[1], [0], [0], [1], [0, 0, 1, 1], [], []>} : vector<8x128xbf16>, vector<128x256xbf16>, vector<8x256xf32> -> vector<8x256xf32>
    %13 = vector.extract_strided_slice %9 {offsets = [0, 0], sizes = [8, 128], strides = [1, 1]} : vector<8x256xf32> to vector<8x128xf32>
    %14 = vector.extract_strided_slice %9 {offsets = [0, 128], sizes = [8, 128], strides = [1, 1]} : vector<8x256xf32> to vector<8x128xf32>
    %15 = vector.extract_strided_slice %12 {offsets = [0, 0], sizes = [8, 128], strides = [1, 1]} : vector<8x256xf32> to vector<8x128xf32>
    %16 = vector.extract_strided_slice %12 {offsets = [0, 128], sizes = [8, 128], strides = [1, 1]} : vector<8x256xf32> to vector<8x128xf32>
    %17 = arith.mulf %13, %13 : vector<8x128xf32>
    %18 = arith.mulf %14, %14 : vector<8x128xf32>
    %19 = arith.addf %17, %18 : vector<8x128xf32>
    %20 = math.sqrt %19 : vector<8x128xf32>
    %cst_11 = arith.constant 1.000000e-07 : f32
    %21 = vector.broadcast %cst_11 : f32 to vector<8x128xf32>
    %22 = arith.addf %20, %21 : vector<8x128xf32>
    %23 = arith.mulf %15, %15 : vector<8x128xf32>
    %24 = arith.mulf %16, %16 : vector<8x128xf32>
    %25 = arith.addf %23, %24 : vector<8x128xf32>
    %26 = math.sqrt %25 : vector<8x128xf32>
    %cst_12 = arith.constant 1.000000e-07 : f32
    %27 = vector.broadcast %cst_12 : f32 to vector<8x128xf32>
    %28 = arith.addf %26, %27 : vector<8x128xf32>
    %29 = arith.subf %22, %28 : vector<8x128xf32>
    %30 = arith.addf %22, %28 : vector<8x128xf32>
    %31 = tpu.reciprocal %28 {approx = true} : vector<8x128xf32> -> vector<8x128xf32>
    %32 = arith.mulf %29, %31 : vector<8x128xf32>
    %cst_13 = arith.constant 1.000000e+00 : f32
    %33 = vector.broadcast %cst_13 : f32 to vector<8x128xf32>
    %34 = arith.addf %33, %32 : vector<8x128xf32>
    %35 = math.log %34 : vector<8x128xf32>
    %36 = math.absf %35 : vector<8x128xf32>
    %c0_14 = arith.constant 0 : index
    %c0_15 = arith.constant 0 : index
    %c0_16 = arith.constant 0 : index
    %37 = vector.load %arg7[%c0_14, %c0_15, %c0_16] : memref<1x8x128xf32, #tpu.memory_space<vmem>>, vector<1x8x128xf32>
    %38 = arith.mulf %29, %29 : vector<8x128xf32>
    %39 = vector.shape_cast %38 : vector<8x128xf32> to vector<1x8x128xf32>
    %cst_17 = arith.constant dense<0.000000e+00> : vector<8x128xf32>
    %40 = vector.multi_reduction <add>, %39, %cst_17 [0] : vector<1x8x128xf32> to vector<8x128xf32>
    %41 = vector.shape_cast %40 : vector<8x128xf32> to vector<1x8x128xf32>
    %42 = arith.addf %37, %41 : vector<1x8x128xf32>
    %c0_18 = arith.constant 0 : index
    %c0_19 = arith.constant 0 : index
    %c0_20 = arith.constant 0 : index
    %43 = vector.load %arg7[%c0_18, %c0_19, %c0_20] : memref<1x8x128xf32, #tpu.memory_space<vmem>>, vector<1x8x128xf32>
    tpu.vector_store %arg7[%c0_18, %c0_19, %c0_20], %42 {strides = array<i32>} : memref<1x8x128xf32, #tpu.memory_space<vmem>>, vector<1x8x128xf32>,
    %c0_21 = arith.constant 0 : index
    %c0_22 = arith.constant 0 : index
    %c0_23 = arith.constant 0 : index
    %44 = vector.load %arg8[%c0_21, %c0_22, %c0_23] : memref<1x8x128xf32, #tpu.memory_space<vmem>>, vector<1x8x128xf32>
    %45 = arith.mulf %30, %30 : vector<8x128xf32>
    %46 = vector.shape_cast %45 : vector<8x128xf32> to vector<1x8x128xf32>
    %cst_24 = arith.constant dense<0.000000e+00> : vector<8x128xf32>
    %47 = vector.multi_reduction <add>, %46, %cst_24 [0] : vector<1x8x128xf32> to vector<8x128xf32>
    %48 = vector.shape_cast %47 : vector<8x128xf32> to vector<1x8x128xf32>
    %49 = arith.addf %44, %48 : vector<1x8x128xf32>
    %c0_25 = arith.constant 0 : index
    %c0_26 = arith.constant 0 : index
    %c0_27 = arith.constant 0 : index
    %50 = vector.load %arg8[%c0_25, %c0_26, %c0_27] : memref<1x8x128xf32, #tpu.memory_space<vmem>>, vector<1x8x128xf32>
    tpu.vector_store %arg8[%c0_25, %c0_26, %c0_27], %49 {strides = array<i32>} : memref<1x8x128xf32, #tpu.memory_space<vmem>>, vector<1x8x128xf32>,
    %c0_28 = arith.constant 0 : index
    %c0_29 = arith.constant 0 : index
    %c0_30 = arith.constant 0 : index
    %51 = vector.load %arg9[%c0_28, %c0_29, %c0_30] : memref<1x8x128xf32, #tpu.memory_space<vmem>>, vector<1x8x128xf32>
    %52 = vector.shape_cast %36 : vector<8x128xf32> to vector<1x8x128xf32>
    %cst_31 = arith.constant dense<0.000000e+00> : vector<8x128xf32>
    %53 = vector.multi_reduction <add>, %52, %cst_31 [0] : vector<1x8x128xf32> to vector<8x128xf32>
    %54 = vector.shape_cast %53 : vector<8x128xf32> to vector<1x8x128xf32>
    %55 = arith.addf %51, %54 : vector<1x8x128xf32>
    %c0_32 = arith.constant 0 : index
    %c0_33 = arith.constant 0 : index
    %c0_34 = arith.constant 0 : index
    %56 = vector.load %arg9[%c0_32, %c0_33, %c0_34] : memref<1x8x128xf32, #tpu.memory_space<vmem>>, vector<1x8x128xf32>
    tpu.vector_store %arg9[%c0_32, %c0_33, %c0_34], %55 {strides = array<i32>} : memref<1x8x128xf32, #tpu.memory_space<vmem>>, vector<1x8x128xf32>,
    return
  }
  func.func @transform_0(%arg0: i32, %arg1: i32, %arg2: i32, %arg3: i32) -> (i32, i32, i32) {
    %c1_i32 = arith.constant 1 : i32
    %0 = arith.muli %arg1, %c1_i32 : i32
    %1 = arith.addi %0, %arg3 : i32
    %c0_i32 = arith.constant 0 : i32
    %c0_i32_0 = arith.constant 0 : i32
    return %arg0, %1, %c0_i32 : i32, i32, i32
  }
  func.func @transform_1(%arg0: i32, %arg1: i32, %arg2: i32, %arg3: i32) -> (i32, i32, i32) {
    %c1_i32 = arith.constant 1 : i32
    %0 = arith.muli %arg1, %c1_i32 : i32
    %1 = arith.addi %0, %arg3 : i32
    %c0_i32 = arith.constant 0 : i32
    %c0_i32_0 = arith.constant 0 : i32
    return %arg0, %1, %c0_i32 : i32, i32, i32
  }
  func.func @transform_2(%arg0: i32, %arg1: i32, %arg2: i32, %arg3: i32) -> (i32, i32, i32) {
    %c0_i32 = arith.constant 0 : i32
    %c0_i32_0 = arith.constant 0 : i32
    %c0_i32_1 = arith.constant 0 : i32
    return %arg2, %c0_i32, %c0_i32_0 : i32, i32, i32
  }
  func.func @transform_3(%arg0: i32, %arg1: i32, %arg2: i32, %arg3: i32) -> (i32, i32, i32) {
    %c0_i32 = arith.constant 0 : i32
    %c0_i32_0 = arith.constant 0 : i32
    return %arg0, %arg1, %c0_i32 : i32, i32, i32
  }
  func.func @transform_4(%arg0: i32, %arg1: i32, %arg2: i32, %arg3: i32) -> (i32, i32, i32) {
    %c0_i32 = arith.constant 0 : i32
    %c0_i32_0 = arith.constant 0 : i32
    return %arg0, %arg1, %c0_i32 : i32, i32, i32
  }
  func.func @transform_5(%arg0: i32, %arg1: i32, %arg2: i32, %arg3: i32) -> (i32, i32, i32) {
    %c0_i32 = arith.constant 0 : i32
    %c0_i32_0 = arith.constant 0 : i32
    return %arg0, %arg1, %c0_i32 : i32, i32, i32
  }
}

</mosaic_0001>

<bundles_post_ra>
// kernel: _sss_call.1
= control target key start
LH: loop header
LB: loop body
LE: loop exit
PB: predicated region body
PF: predicated region fallthrough
CT: control target
= control target key end

     0   :  { %11 = vsyncpa [#allocation3], 0  ;;  %s984_s18 = smov 0   ;;  %s986_s19 = smov 0   ;;  %s1073_s0 = inlined_call_operand.vmem [shape: bf16[2,8,128], index: 0, kind: input, shape index: {}]   ;;  %s1074_s1 = inlined_call_operand.vmem [shape: bf16[2,8,128], index: 1, kind: input, shape index: {}]   ;;  %s1075_s2 = inlined_call_operand.hbm [shape: bf16[1,128,256], index: 2, kind: input, shape index: {}]   ;;  %s1076_s3 = inlined_call_operand.vmem [shape: f32[2,8,128], index: 3, kind: output, shape index: {0}]   ;;  %s1077_s4 = inlined_call_operand.vmem [shape: f32[2,8,128], index: 4, kind: output, shape index: {1}]   ;;  %s1078_s5 = inlined_call_operand.vmem [shape: f32[2,8,128], index: 5, kind: output, shape index: {2}]  }
   0x1   :  { %s988_s20 = smov 0  }
   0x2 LB: > { %s793_s21 = sadd.s32 4294967295, %s948_s20   ;;  %s43_s22 = sadd.s32 1, %s944_s19  ;;  %s948_s20 = sphi %s988_s20, %s17_s20   ;;  %s944_s19 = sphi %s986_s19, %s1088_s19   ;;  %s940_s18 = sphi %s984_s18, %s1087_s18  }
   0x3   : > { %p45_p0 = scmp.ge.s32.totalorder %s43_s22, 2  ;;  %p795_p1 = scmp.ge.s32.totalorder %s948_s20, 1 }
   0x4   : > { %p218_p2 = scmp.lt.s32.totalorder %s948_s20, 3  ;;  %p1009_p4 = scmp.eq.s32.totalorder %s793_s21, 0 }
   0x5   : > { %s1090_s22 = smov (%p45_p0, %s43_s22), 0  ;;  %s950_s25 = smov [#allocation2]  }
   0x6   : > { %p1005_p3 = pnand %p795_p1, %p218_p2  ;;  %s233_s26 = sshll.u32 %s950_s25, 4  ;;  %s234_s26 = int_to_ptr.vmem [resolvable:$true] %s233_s26 }
   0x7   : > { %s1083_s24 = scalar_select %p1009_p4, 1, 0 }
   0x8   : > { %s1082_s23 = scalar_select %p1005_p3, 1, 0 }
   0x9   : > { %p827_p5 = pneg %p1005_p3  ;;  %s894_s30 = scalar_lea.hbm %s1075_s2, 2048 }
   0xa   : > { %p895_p7 = scmp.ne.s32.totalorder %s1075_s2, %s894_s30  ;;  %p901_p11 = scmp.lt.u32.totalorder %s894_s30, %s1075_s2 }
   0xb   : > { %p1017_p6 = pnand %p1009_p4, %p827_p5 }
   0xd   : > { %p896_p8 = pneg %p1017_p6 }
   0xf   : > { %p897_p9 = pnand %p896_p8, %p895_p7 }
  0x11   : > { %p898_p10 = pneg %p897_p9 }
  0x13   : > { %p903_p12 = pnand %p901_p11, %p898_p10 }
  0x15   : > { %906 = shalt.err (!%p903_p12)
}
  0x16   : > { %s907_s10 = scalar_lea.vmem %s234_s26, 2048  ;;  %p915_p2 = scmp.lt.s32.totalorder %s234_s26, %s234_s26 }
  0x17   : > { %p908_p13 = scmp.ne.s32.totalorder %s234_s26, %s907_s10  ;;  %p916_p5 = scmp.lt.s32.totalorder %s907_s10, %s907_s10 }
  0x19   : > { %p910_p0 = pnand %p908_p13, %p896_p8  ;;  %p917_p4 = por %p916_p5, %p915_p2 }
  0x1b   : > { %p911_p1 = pneg %p910_p0 }
  0x1d   : > { %p918_p3 = pnand %p917_p4, %p911_p1 }
  0x1f   : > { %921 = shalt.err (!%p918_p3)
}
  0x20   : > { %s951_s11 = smov 128   ;;  %s952_s12 = smov 8  }
  0x21   : > { %830 = dma.hbm_to_vmem [thread:$0]  (!%p1017_p6), %s1075_s2, 2048, %s234_s26, [#allocation3], %s951_s11, %s951_s11, %s952_s12  }
  0x22   : > { %p1085_p7 = scmp.ne.s32.totalorder %s1082_s23, 0 }
  0x23   : > { %p1086_p9 = scmp.ne.s32.totalorder (!%p1085_p7), %s1083_s24, 0 }
  0x24   : > { %273 = sbr.rel (%p1085_p7) target bundleno = 344 (0x158), region = 32 }
  0x2b   : > { %935 = dma.done.wait (%p1086_p9), [#allocation3], 2048  }
  0x2c   : > { %937 = vsyncadd (%p1086_p9), [#allocation3], 4294965248  ;;  %v953_v0 = vmov 0   ;;  %v862_v1 = vld [vmem:[#allocation2 + $0x4] ss:$8 sps:$4 sm:$0xff]   ;;  %p329_p3 = scmp.lt.s32.totalorder %s940_s18, 1 }
  0x2d   : > { %506 = vmatprep.mubr.bf16.mxu0 %v953_v0  ;;  %548 = vmatprep.mubr.bf16.mxu1 %v953_v0  ;;  %v864_v2 = vld [vmem:[#allocation2] ss:$8 sps:$4 sm:$0xff]   ;;  %v865_v3 = vld [vmem:[#allocation2 + $0x14] ss:$8 sps:$4 sm:$0xff]   ;;  %v867_v4 = vld [vmem:[#allocation2 + $0x10] ss:$8 sps:$4 sm:$0xff]  }
  0x2e   : > { %474 = vmatprep.subr.bf16.mxu0 %v862_v1  ;;  %516 = vmatprep.subr.bf16.mxu1 %v862_v1  ;;  %v868_v5 = vld [vmem:[#allocation2 + $0x24] ss:$8 sps:$4 sm:$0xff]   ;;  %v870_v6 = vld [vmem:[#allocation2 + $0x20] ss:$8 sps:$4 sm:$0xff]   ;;  %v871_v7 = vld [vmem:[#allocation2 + $0x34] ss:$8 sps:$4 sm:$0xff]  }
  0x2f   : > { %475 = vmatpush1.bf16.msra.mxu0 %v864_v2  ;;  %517 = vmatpush1.bf16.msra.mxu1 %v864_v2  ;;  %v873_v8 = vld [vmem:[#allocation2 + $0x30] ss:$8 sps:$4 sm:$0xff]   ;;  %v874_v9 = vld [vmem:[#allocation2 + $0x44] ss:$8 sps:$4 sm:$0xff]   ;;  %v876_v10 = vld [vmem:[#allocation2 + $0x40] ss:$8 sps:$4 sm:$0xff]  }
  0x30   : > { %476 = vmatprep.subr.bf16.mxu0 %v865_v3  ;;  %518 = vmatprep.subr.bf16.mxu1 %v865_v3  ;;  %v877_v11 = vld [vmem:[#allocation2 + $0x54] ss:$8 sps:$4 sm:$0xff]   ;;  %v879_v12 = vld [vmem:[#allocation2 + $0x50] ss:$8 sps:$4 sm:$0xff]   ;;  %v880_v13 = vld [vmem:[#allocation2 + $0x64] ss:$8 sps:$4 sm:$0xff]  }
  0x31   : > { %s1092_s18 = smov (!%p329_p3, %s940_s18), 1  ;;  %v882_v14 = vld [vmem:[#allocation2 + $0x60] ss:$8 sps:$4 sm:$0xff]   ;;  %v883_v15 = vld [vmem:[#allocation2 + $0x74] ss:$8 sps:$4 sm:$0xff]  }
  0x32   : > { %s800_s15 = sshll.u32 %s1092_s18, 2  ;;  %v885_v16 = vld [vmem:[#allocation2 + $0x70] ss:$8 sps:$4 sm:$0xff]   ;;  %s802_s26 = sshll.u32 %s1092_s18, 3 }
  0x33   : > { %477 = vmatpush1.bf16.msra.mxu0 %v867_v4  ;;  %519 = vmatpush1.bf16.msra.mxu1 %v867_v4  ;;  %s335_s21 = scalar_lea.vmem %s1073_s0, %s800_s15  ;;  %s344_s25 = scalar_lea.vmem %s1074_s1, %s800_s15 }
  0x34   : > { %478 = vmatprep.subr.bf16.mxu0 %v868_v5  ;;  %520 = vmatprep.subr.bf16.mxu1 %v868_v5  ;;  %v393_v17 = vld [vmem:[%s335_s21] sm:$0xf]  ;;  %s352_s29 = scalar_lea.vmem %s1076_s3, %s802_s26  ;;  %s359_s7 = scalar_lea.vmem %s1077_s4, %s802_s26 }
  0x35   : > { %v515_v18 = vld [vmem:[%s344_s25] sm:$0xf]  ;;  %s366_s9 = scalar_lea.vmem %s1078_s5, %s802_s26 }
  0x37   : > { %479 = vmatpush1.bf16.msra.mxu0 %v870_v6  ;;  %521 = vmatpush1.bf16.msra.mxu1 %v870_v6 }
  0x38   : > { %480 = vmatprep.subr.bf16.mxu0 %v871_v7  ;;  %522 = vmatprep.subr.bf16.mxu1 %v871_v7 }
  0x3b   : > { %481 = vmatpush1.bf16.msra.mxu0 %v873_v8  ;;  %523 = vmatpush1.bf16.msra.mxu1 %v873_v8 }
  0x3c   : > { %482 = vmatprep.subr.bf16.mxu0 %v874_v9  ;;  %524 = vmatprep.subr.bf16.mxu1 %v874_v9 }
  0x3f   : > { %483 = vmatpush1.bf16.msra.mxu0 %v876_v10  ;;  %525 = vmatpush1.bf16.msra.mxu1 %v876_v10 }
  0x40   : > { %484 = vmatprep.subr.bf16.mxu0 %v877_v11  ;;  %526 = vmatprep.subr.bf16.mxu1 %v877_v11 }
  0x43   : > { %485 = vmatpush1.bf16.msra.mxu0 %v879_v12  ;;  %527 = vmatpush1.bf16.msra.mxu1 %v879_v12 }
  0x44   : > { %486 = vmatprep.subr.bf16.mxu0 %v880_v13  ;;  %528 = vmatprep.subr.bf16.mxu1 %v880_v13 }
  0x47   : > { %487 = vmatpush1.bf16.msra.mxu0 %v882_v14  ;;  %529 = vmatpush1.bf16.msra.mxu1 %v882_v14 }
  0x48   : > { %488 = vmatprep.subr.bf16.mxu0 %v883_v15  ;;  %530 = vmatprep.subr.bf16.mxu1 %v883_v15 }
  0x4b   : > { %489 = vmatpush1.bf16.msra.mxu0 %v885_v16  ;;  %531 = vmatpush1.bf16.msra.mxu1 %v885_v16 }
  0x4e   : > { %507 = vmatmul.mubr.bf16.vlgmr.msra.gmra.mrb[0].mxu0 %v393_v17  ;;  %549 = vmatmul.mubr.bf16.vlgmr.msra.gmra.mrb[0].mxu1 %v515_v18 }
 0x121   : > { %v508_v19 = vpop.f32.mrb[0].mxu0  ;;  %v550_v20 = vpop.f32.mrb[0].mxu1 }
 0x122   : > { %v557_v21 = vmul.f32 %v508_v19, %v508_v19  ;;  %v568_v22 = vmul.f32 %v550_v20, %v550_v20  ;;  %v510_v23 = vpop.f32.mrb[1].mxu0  ;;  %v552_v24 = vpop.f32.mrb[1].mxu1 }
 0x123   : > { %v558_v25 = vmul.f32 %v510_v23, %v510_v23  ;;  %v569_v26 = vmul.f32 %v552_v24, %v552_v24  ;;  %v554_v27 = vpop.f32.mrb[2].mxu1  ;;  %v512_v28 = vpop.f32.mrb[2].mxu0 }
 0x124   : > { %v555_v29 = vpop.f32.mrb[3].mxu1  ;;  %v513_v30 = vpop.f32.mrb[3].mxu0 }
 0x125   : > { %v559_v31 = vadd.f32 %v558_v25, %v557_v21  ;;  %v570_v32 = vadd.f32 %v569_v26, %v568_v22 }
 0x127   : > { %886 = vrsqrt.f32 %v559_v31  ;;  %vm562_vm0 = vcmp.eq.f32.partialorder %v559_v31, inf  ;;  %v565_v36 = vand.u32 2147483648, %v559_v31  ;;  %vm564_vm1 = vcmp.eq.f32.partialorder %v559_v31, 0.0 }
 0x128   : > { %888 = vrsqrt.f32 %v570_v32  ;;  %vm573_vm2 = vcmp.eq.f32.partialorder %v570_v32, inf  ;;  %v576_v39 = vand.u32 2147483648, %v570_v32  ;;  %vm575_vm3 = vcmp.eq.f32.partialorder %v570_v32, 0.0 }
 0x131   : > { %v887_v33 = vpop.eup %886 }
 0x132   : > { %v889_v34 = vpop.eup %888  ;;  %v561_v35 = vmul.f32 %v887_v33, %v559_v31 }
 0x133   : > { %v572_v37 = vmul.f32 %v889_v34, %v570_v32 }
 0x134   : > { %v563_v38 = vsel %vm562_vm0, %v559_v31, %v561_v35 }
 0x135   : > { %v566_v40 = vsel %vm564_vm1, %v565_v36, %v563_v38  ;;  %v574_v41 = vsel %vm573_vm2, %v570_v32, %v572_v37 }
 0x136   : > { %v567_v42 = vadd.f32 1e-07, %v566_v40  ;;  %v577_v43 = vsel %vm575_vm3, %v576_v39, %v574_v41 }
 0x137   : > { %v578_v44 = vadd.f32 1e-07, %v577_v43 }
 0x139   : > { %v579_v45 = vsub.f32 %v567_v42, %v578_v44  ;;  %v580_v46 = vadd.f32 %v578_v44, %v567_v42  ;;  %890 = vrcp.f32 %v578_v44 }
 0x13b   : > { %v588_v47 = vmul.f32 %v579_v45, %v579_v45  ;;  %v593_v48 = vmul.f32 %v580_v46, %v580_v46 }
 0x13d   : > { %591 = vst [vmem:[%s352_s29] sm:$0xff] %v588_v47  ;;  %596 = vst [vmem:[%s359_s7] sm:$0xff] %v593_v48 }
 0x143   : > { %v891_v49 = vpop.eup %890 }
 0x144   : > { %v582_v50 = vmul.f32 %v891_v49, %v579_v45 }
 0x146   : > { %v583_v51 = vadd.f32 1.0, %v582_v50 }
 0x148   : > { %892 = vlog2.f32 %v583_v51 }
 0x152   : > { %v893_v52 = vpop.eup %892 }
 0x153   : > { %v585_v53 = vmul.f32 0.6931472, %v893_v52 }
 0x155   : > { %v586_v54 = vand.u32 2147483647, %v585_v53 }
 0x157   : > { %600 = vst [vmem:[%s366_s9] sm:$0xff] %v586_v54 }
 0x158 PF: > { %s17_s20 = sadd.s32 1, %s948_s20   ;;  %s1087_s18 = smov %s944_s19 }
 0x159   : > { %p14_p4 = scmp.ge.s32.totalorder %s17_s20, 4   ;;  %s1088_s19 = smov %s1090_s22 }
 0x15b   :  { %16 = sbr.rel (!%p14_p4) target bundleno = 2 (0x2), region = 99 }
 0x162   :  { %666 = vsyncpa [#allocation3], 1 }
 0x163   :  { %668 = vsyncpa [#allocation3 + $0x1], 1 }

</bundles_post_ra>
